<compile_context>
chip_gen: v5e
topology: v5e:2x2
jax: 0.10.0
libtpu: 0.0.40
codegen_flags: <defaults>
</compile_context>

<pallas_src>
import functools

import jax
import jax.numpy as jnp
from jax.experimental import pallas as pl
from jax.experimental.pallas import tpu as pltpu

BINS = 10
LOSS_WEIGHT = 1.0


def _round_up(x, m):
    return ((x + m - 1) // m) * m


def _ghmc_partial_kernel(pred_ref, target_ref, lw_ref, out_ref, *,
                         bins, total_rows, tile_rows):
    # pred/target/lw blocks: (tile_rows, C)
    # out block: (1, 2*bins, C)  rows 0..bins-1: counts, bins..2*bins-1: bce sums
    p = pl.program_id(0)
    t = pl.program_id(1)

    @pl.when(t == 0)
    def _init():
        out_ref[...] = jnp.zeros_like(out_ref)

    pred = pred_ref[...].astype(jnp.float32)
    target = target_ref[...].astype(jnp.float32)
    lw = lw_ref[...].astype(jnp.float32)
    tb, c = pred.shape

    # Global row indices of this tile (unclamped grid position) -> mask rows
    # past the array end (partial last tile / megacore over-coverage would
    # otherwise contribute garbage).
    base = (p * pl.num_programs(1) + t) * tile_rows
    row_ids = base + jax.lax.broadcasted_iota(jnp.int32, (tb, c), 0)
    in_range = row_ids < total_rows

    sig = jax.nn.sigmoid(pred)
    g = jnp.abs(sig - target)
    # valid = label_weight > 0 and g inside the binned range [0, 1+1e-6)
    valid = (lw > 0.0) & (g < jnp.float32(1.0 + 1e-6)) & in_range

    # bin index: min(floor(g*bins), bins-1); the clamp plays the role of the
    # +1e-6 bump on the last edge (g == 1.0 lands in the last bin).  Fold the
    # validity mask in once via a sentinel so each bin costs a single compare.
    bin_idx = jnp.minimum(jnp.floor(g * jnp.float32(bins)),
                          jnp.float32(bins - 1))
    bin_idx = jnp.where(valid, bin_idx, jnp.float32(-1.0))

    # binary_cross_entropy_with_logits, reusing the sigmoid for the log term:
    #   log1p(exp(-|x|)) == -log(sigmoid(|x|));  sigmoid(|x|) = sig (x>=0)
    #   else 1 - sig, always in [0.5, 1) so no cancellation.
    log_term = -jnp.log(jnp.where(pred >= 0.0, sig, 1.0 - sig))
    bce = jnp.maximum(pred, 0.0) - pred * target + log_term

    # Per-bin, per-lane partial counts / bce sums packed into a (2*bins, C)
    # update block (pure elementwise placement, no scatter needed).
    out_rows = jax.lax.broadcasted_iota(jnp.int32, (2 * bins, c), 0)
    update = jnp.zeros((2 * bins, c), jnp.float32)
    for i in range(bins):
        mask = bin_idx == jnp.float32(i)
        cnt = jnp.sum(jnp.where(mask, 1.0, 0.0), axis=0, keepdims=True)
        bsum = jnp.sum(jnp.where(mask, bce, 0.0), axis=0, keepdims=True)
        update = jnp.where(out_rows == i, cnt, update)
        update = jnp.where(out_rows == bins + i, bsum, update)

    out_ref[...] += update.reshape(1, 2 * bins, c)


@functools.partial(jax.jit, static_argnames=("block_rows",))
def ghmc_loss(pred, target, label_weight, *, block_rows=1024):
    """GHM-C loss. pred/target/label_weight: [batch_num, class_num]."""
    assert pred.shape == target.shape == label_weight.shape
    c = pred.shape[-1]
    pred2 = pred.reshape(-1, c)
    target2 = target.reshape(-1, c)
    lw2 = label_weight.reshape(-1, c)
    b = pred2.shape[0]

    # Row tile: multiple of 8 (or the full extent), sized so each
    # double-buffered input block stays ~<= 2 MiB of VMEM.
    itemsize = max(jnp.dtype(pred2.dtype).itemsize,
                   jnp.dtype(target2.dtype).itemsize,
                   jnp.dtype(lw2.dtype).itemsize, 1)
    c_pad = _round_up(c, 128)
    budget_rows = max(8, ((2 * 1024 * 1024) // (c_pad * itemsize)) // 8 * 8)
    cap = min(block_rows, budget_rows)
    tile_rows = b if b <= cap else cap

    total_tiles = pl.cdiv(b, tile_rows)
    num_parts = 2 if total_tiles >= 2 else 1          # v7x megacore split
    tiles_per_part = pl.cdiv(total_tiles, num_parts)
    last_block = total_tiles - 1

    def in_map(p, t):
        # Clamp so over-coverage tiles never point past the array; their rows
        # are masked out in-kernel via the (unclamped) global row index.
        return (jnp.minimum(p * tiles_per_part + t, last_block), 0)

    kernel = functools.partial(
        _ghmc_partial_kernel, bins=BINS, total_rows=b, tile_rows=tile_rows)

    partial = pl.pallas_call(
        kernel,
        out_shape=jax.ShapeDtypeStruct((num_parts, 2 * BINS, c), jnp.float32),
        grid=(num_parts, tiles_per_part),
        in_specs=[pl.BlockSpec((tile_rows, c), in_map) for _ in range(3)],
        out_specs=pl.BlockSpec((1, 2 * BINS, c), lambda p, t: (p, 0, 0)),
        compiler_params=pltpu.CompilerParams(
            dimension_semantics=("parallel", "arbitrary")),
    )(pred2, target2, lw2)

    # Tiny finalize on [2*BINS] scalars (tot cancels algebraically).
    per_bin = jnp.sum(partial, axis=(0, 2))           # (2*BINS,)
    counts = per_bin[:BINS]
    bce_sums = per_bin[BINS:]
    has = counts > 0.0
    n_bins = jnp.sum(has.astype(jnp.float32))
    contrib = jnp.where(has, bce_sums / jnp.maximum(counts, 1.0), 0.0)
    loss = jnp.where(
        n_bins > 0.0, jnp.sum(contrib) / jnp.maximum(n_bins, 1.0), 0.0
    )
    return loss * jnp.float32(LOSS_WEIGHT)


def _reference(pred, target, label_weight):
    # Pure-JAX mirror of the PyTorch forward (momentum=0).
    pred = pred.astype(jnp.float32)
    target = target.astype(jnp.float32)
    lw = label_weight.astype(jnp.float32)
    edges = [i / BINS for i in range(BINS + 1)]
    edges[-1] += 1e-6
    g = jnp.abs(jax.nn.sigmoid(pred) - target)
    valid = lw > 0
    tot = jnp.maximum(jnp.sum(valid.astype(jnp.float32)), 1.0)
    weights = jnp.zeros_like(pred)
    n = 0.0
    for i in range(BINS):
        inds = (g >= edges[i]) & (g < edges[i + 1]) & valid
        num = jnp.sum(inds.astype(jnp.float32))
        has = num > 0
        weights = weights + inds.astype(jnp.float32) * jnp.where(
            has, tot / jnp.maximum(num, 1.0), 0.0
        )
        n = n + has.astype(jnp.float32)
    weights = jnp.where(n > 0, weights / jnp.maximum(n, 1.0), weights)
    bce = (
        jnp.maximum(pred, 0.0)
        - pred * target
        + jnp.log1p(jnp.exp(-jnp.abs(pred)))
    )
    return jnp.sum(weights * bce) / tot * LOSS_WEIGHT


if __name__ == "__main__":
    key = jax.random.PRNGKey(0)
    k1, k2, k3 = jax.random.split(key, 3)

    # Small case (single tile).
    batch_num, class_num = 16, 32
    pred = jax.random.normal(k1, (batch_num, class_num), dtype=jnp.float32)
    target = (
        jax.random.uniform(k2, (batch_num, class_num)) > 0.5
    ).astype(jnp.float32)
    label_weight = (
        jax.random.uniform(k3, (batch_num, class_num)) > 0.1
    ).astype(jnp.float32)

    loss = jax.block_until_ready(ghmc_loss(pred, target, label_weight))
    ref = _reference(pred, target, label_weight)
    assert jnp.allclose(loss, ref, rtol=1e-4, atol=1e-5), (loss, ref)

    # Larger case exercising the tiled, two-partition path and the ragged
    # row-tail masking (1000 is not a multiple of the row tile).
    kb1, kb2, kb3 = jax.random.split(jax.random.PRNGKey(1), 3)
    b2, c2 = 1000, 200
    pred2 = jax.random.normal(kb1, (b2, c2), dtype=jnp.float32)
    target2 = (jax.random.uniform(kb2, (b2, c2)) > 0.5).astype(jnp.float32)
    lw2 = (jax.random.uniform(kb3, (b2, c2)) > 0.1).astype(jnp.float32)

    loss2 = jax.block_until_ready(ghmc_loss(pred2, target2, lw2, block_rows=512))
    ref2 = _reference(pred2, target2, lw2)
    assert jnp.allclose(loss2, ref2, rtol=1e-4, atol=1e-5), (loss2, ref2)

    print("KERNEL_OK")
</pallas_src>

<mosaic_0001>
module attributes {stable_mosaic.version = 11 : i64} {
  func.func @_ghmc_partial_kernel(%arg0: i32, %arg1: i32, %arg2: memref<16x32xf32, #tpu.memory_space<vmem>>, %arg3: memref<16x32xf32, #tpu.memory_space<vmem>>, %arg4: memref<16x32xf32, #tpu.memory_space<vmem>>, %arg5: memref<1x20x32xf32, #tpu.memory_space<vmem>>) attributes {dimension_semantics = [#tpu.dimension_semantics<parallel>, #tpu.dimension_semantics<arbitrary>], iteration_bounds = array<i64: 1, 1>, scalar_prefetch = 0 : i64, scratch_operands = 0 : i64, tpu.core_type = #tpu.core_type<tc>, window_params = [{transform_indices = @transform_0, window_bounds = array<i64: 16, 32>}, {transform_indices = @transform_1, window_bounds = array<i64: 16, 32>}, {transform_indices = @transform_2, window_bounds = array<i64: 16, 32>}, {transform_indices = @transform_3, window_bounds = array<i64: 1, 20, 32>}]} {
    %c0_i32 = arith.constant 0 : i32
    %0 = arith.cmpi eq, %arg1, %c0_i32 : i32
    %1 = arith.extui %0 : i1 to i32
    %c0_i32_0 = arith.constant 0 : i32
    %2 = arith.cmpi ne, %1, %c0_i32_0 : i32
    scf.if %2 {
      %cst_86 = arith.constant 0.000000e+00 : f32
      %263 = vector.broadcast %cst_86 : f32 to vector<1x20x32xf32>
      %c0_87 = arith.constant 0 : index
      %c0_88 = arith.constant 0 : index
      %c0_89 = arith.constant 0 : index
      %264 = vector.load %arg5[%c0_87, %c0_88, %c0_89] : memref<1x20x32xf32, #tpu.memory_space<vmem>>, vector<1x20x32xf32>
      tpu.vector_store %arg5[%c0_87, %c0_88, %c0_89], %263 {strides = array<i32>} : memref<1x20x32xf32, #tpu.memory_space<vmem>>, vector<1x20x32xf32>,
    } else {
    }
    %c0 = arith.constant 0 : index
    %c0_1 = arith.constant 0 : index
    %3 = vector.load %arg2[%c0, %c0_1] : memref<16x32xf32, #tpu.memory_space<vmem>>, vector<16x32xf32>
    %c0_2 = arith.constant 0 : index
    %c0_3 = arith.constant 0 : index
    %4 = vector.load %arg3[%c0_2, %c0_3] : memref<16x32xf32, #tpu.memory_space<vmem>>, vector<16x32xf32>
    %c0_4 = arith.constant 0 : index
    %c0_5 = arith.constant 0 : index
    %5 = vector.load %arg4[%c0_4, %c0_5] : memref<16x32xf32, #tpu.memory_space<vmem>>, vector<16x32xf32>
    %c1_i32 = arith.constant 1 : i32
    %6 = arith.muli %arg0, %c1_i32 : i32
    %7 = arith.addi %6, %arg1 : i32
    %c16_i32 = arith.constant 16 : i32
    %8 = arith.muli %7, %c16_i32 : i32
    %9 = tpu.iota {dimensions = array<i32: 0>} : vector<16x32xi32>
    %10 = vector.broadcast %8 : i32 to vector<16x32xi32>
    %11 = arith.addi %10, %9 : vector<16x32xi32>
    %c16_i32_6 = arith.constant 16 : i32
    %12 = vector.broadcast %c16_i32_6 : i32 to vector<16x32xi32>
    %13 = arith.cmpi slt, %11, %12 : vector<16x32xi32>
    %14 = arith.negf %3 : vector<16x32xf32>
    %15 = math.exp %14 : vector<16x32xf32>
    %cst = arith.constant 1.000000e+00 : f32
    %16 = vector.broadcast %cst : f32 to vector<16x32xf32>
    %17 = arith.addf %16, %15 : vector<16x32xf32>
    %18 = arith.divf %16, %17 : vector<16x32xf32>
    %19 = arith.subf %18, %4 : vector<16x32xf32>
    %20 = math.absf %19 : vector<16x32xf32>
    %cst_7 = arith.constant 0.000000e+00 : f32
    %21 = vector.broadcast %cst_7 : f32 to vector<16x32xf32>
    %22 = arith.cmpf ogt, %5, %21 : vector<16x32xf32>
    %cst_8 = arith.constant 1.00000095 : f32
    %23 = vector.broadcast %cst_8 : f32 to vector<16x32xf32>
    %24 = arith.cmpf olt, %20, %23 : vector<16x32xf32>
    %25 = arith.andi %22, %24 : vector<16x32xi1>
    %26 = arith.andi %25, %13 : vector<16x32xi1>
    %cst_9 = arith.constant 1.000000e+01 : f32
    %27 = vector.broadcast %cst_9 : f32 to vector<16x32xf32>
    %28 = arith.mulf %20, %27 : vector<16x32xf32>
    %29 = math.floor %28 : vector<16x32xf32>
    %cst_10 = arith.constant 9.000000e+00 : f32
    %30 = vector.broadcast %cst_10 : f32 to vector<16x32xf32>
    %31 = arith.minimumf %29, %30 : vector<16x32xf32>
    %cst_11 = arith.constant -1.000000e+00 : f32
    %32 = vector.broadcast %cst_11 : f32 to vector<16x32xf32>
    %33 = arith.select %26, %31, %32 : vector<16x32xi1>, vector<16x32xf32>
    %cst_12 = arith.constant 0.000000e+00 : f32
    %34 = vector.broadcast %cst_12 : f32 to vector<16x32xf32>
    %35 = arith.cmpf oge, %3, %34 : vector<16x32xf32>
    %cst_13 = arith.constant 1.000000e+00 : f32
    %36 = vector.broadcast %cst_13 : f32 to vector<16x32xf32>
    %37 = arith.subf %36, %18 : vector<16x32xf32>
    %38 = arith.select %35, %18, %37 : vector<16x32xi1>, vector<16x32xf32>
    %39 = math.log %38 : vector<16x32xf32>
    %cst_14 = arith.constant 0.000000e+00 : f32
    %40 = vector.broadcast %cst_14 : f32 to vector<16x32xf32>
    %41 = arith.subf %40, %39 : vector<16x32xf32>
    %cst_15 = arith.constant 0.000000e+00 : f32
    %42 = vector.broadcast %cst_15 : f32 to vector<16x32xf32>
    %43 = arith.maximumf %3, %42 : vector<16x32xf32>
    %44 = arith.mulf %3, %4 : vector<16x32xf32>
    %45 = arith.subf %43, %44 : vector<16x32xf32>
    %46 = arith.addf %45, %41 : vector<16x32xf32>
    %47 = tpu.iota {dimensions = array<i32: 0>} : vector<20x32xi32>
    %cst_16 = arith.constant 0.000000e+00 : f32
    %48 = vector.broadcast %cst_16 : f32 to vector<20x32xf32>
    %cst_17 = arith.constant 0.000000e+00 : f32
    %49 = vector.broadcast %cst_17 : f32 to vector<16x32xf32>
    %50 = arith.cmpf oeq, %33, %49 : vector<16x32xf32>
    %cst_18 = arith.constant 1.000000e+00 : f32
    %cst_19 = arith.constant 0.000000e+00 : f32
    %51 = vector.broadcast %cst_18 : f32 to vector<16x32xf32>
    %52 = vector.broadcast %cst_19 : f32 to vector<16x32xf32>
    %53 = arith.select %50, %51, %52 : vector<16x32xi1>, vector<16x32xf32>
    %cst_20 = arith.constant dense<0.000000e+00> : vector<32xf32>
    %54 = vector.multi_reduction <add>, %53, %cst_20 [0] : vector<16x32xf32> to vector<32xf32>
    %55 = vector.shape_cast %54 : vector<32xf32> to vector<1x32xf32>
    %cst_21 = arith.constant 0.000000e+00 : f32
    %56 = vector.broadcast %cst_21 : f32 to vector<16x32xf32>
    %57 = arith.select %50, %46, %56 : vector<16x32xi1>, vector<16x32xf32>
    %cst_22 = arith.constant dense<0.000000e+00> : vector<32xf32>
    %58 = vector.multi_reduction <add>, %57, %cst_22 [0] : vector<16x32xf32> to vector<32xf32>
    %59 = vector.shape_cast %58 : vector<32xf32> to vector<1x32xf32>
    %c0_i32_23 = arith.constant 0 : i32
    %60 = vector.broadcast %c0_i32_23 : i32 to vector<20x32xi32>
    %61 = arith.cmpi eq, %47, %60 : vector<20x32xi32>
    %62 = vector.shape_cast %55 : vector<1x32xf32> to vector<1x32xf32>
    %63 = vector.broadcast %62 : vector<1x32xf32> to vector<20x32xf32>
    %64 = arith.select %61, %63, %48 : vector<20x32xi1>, vector<20x32xf32>
    %c10_i32 = arith.constant 10 : i32
    %65 = vector.broadcast %c10_i32 : i32 to vector<20x32xi32>
    %66 = arith.cmpi eq, %47, %65 : vector<20x32xi32>
    %67 = vector.shape_cast %59 : vector<1x32xf32> to vector<1x32xf32>
    %68 = vector.broadcast %67 : vector<1x32xf32> to vector<20x32xf32>
    %69 = arith.select %66, %68, %64 : vector<20x32xi1>, vector<20x32xf32>
    %cst_24 = arith.constant 1.000000e+00 : f32
    %70 = vector.broadcast %cst_24 : f32 to vector<16x32xf32>
    %71 = arith.cmpf oeq, %33, %70 : vector<16x32xf32>
    %cst_25 = arith.constant 1.000000e+00 : f32
    %cst_26 = arith.constant 0.000000e+00 : f32
    %72 = vector.broadcast %cst_25 : f32 to vector<16x32xf32>
    %73 = vector.broadcast %cst_26 : f32 to vector<16x32xf32>
    %74 = arith.select %71, %72, %73 : vector<16x32xi1>, vector<16x32xf32>
    %cst_27 = arith.constant dense<0.000000e+00> : vector<32xf32>
    %75 = vector.multi_reduction <add>, %74, %cst_27 [0] : vector<16x32xf32> to vector<32xf32>
    %76 = vector.shape_cast %75 : vector<32xf32> to vector<1x32xf32>
    %cst_28 = arith.constant 0.000000e+00 : f32
    %77 = vector.broadcast %cst_28 : f32 to vector<16x32xf32>
    %78 = arith.select %71, %46, %77 : vector<16x32xi1>, vector<16x32xf32>
    %cst_29 = arith.constant dense<0.000000e+00> : vector<32xf32>
    %79 = vector.multi_reduction <add>, %78, %cst_29 [0] : vector<16x32xf32> to vector<32xf32>
    %80 = vector.shape_cast %79 : vector<32xf32> to vector<1x32xf32>
    %c1_i32_30 = arith.constant 1 : i32
    %81 = vector.broadcast %c1_i32_30 : i32 to vector<20x32xi32>
    %82 = arith.cmpi eq, %47, %81 : vector<20x32xi32>
    %83 = vector.shape_cast %76 : vector<1x32xf32> to vector<1x32xf32>
    %84 = vector.broadcast %83 : vector<1x32xf32> to vector<20x32xf32>
    %85 = arith.select %82, %84, %69 : vector<20x32xi1>, vector<20x32xf32>
    %c11_i32 = arith.constant 11 : i32
    %86 = vector.broadcast %c11_i32 : i32 to vector<20x32xi32>
    %87 = arith.cmpi eq, %47, %86 : vector<20x32xi32>
    %88 = vector.shape_cast %80 : vector<1x32xf32> to vector<1x32xf32>
    %89 = vector.broadcast %88 : vector<1x32xf32> to vector<20x32xf32>
    %90 = arith.select %87, %89, %85 : vector<20x32xi1>, vector<20x32xf32>
    %cst_31 = arith.constant 2.000000e+00 : f32
    %91 = vector.broadcast %cst_31 : f32 to vector<16x32xf32>
    %92 = arith.cmpf oeq, %33, %91 : vector<16x32xf32>
    %cst_32 = arith.constant 1.000000e+00 : f32
    %cst_33 = arith.constant 0.000000e+00 : f32
    %93 = vector.broadcast %cst_32 : f32 to vector<16x32xf32>
    %94 = vector.broadcast %cst_33 : f32 to vector<16x32xf32>
    %95 = arith.select %92, %93, %94 : vector<16x32xi1>, vector<16x32xf32>
    %cst_34 = arith.constant dense<0.000000e+00> : vector<32xf32>
    %96 = vector.multi_reduction <add>, %95, %cst_34 [0] : vector<16x32xf32> to vector<32xf32>
    %97 = vector.shape_cast %96 : vector<32xf32> to vector<1x32xf32>
    %cst_35 = arith.constant 0.000000e+00 : f32
    %98 = vector.broadcast %cst_35 : f32 to vector<16x32xf32>
    %99 = arith.select %92, %46, %98 : vector<16x32xi1>, vector<16x32xf32>
    %cst_36 = arith.constant dense<0.000000e+00> : vector<32xf32>
    %100 = vector.multi_reduction <add>, %99, %cst_36 [0] : vector<16x32xf32> to vector<32xf32>
    %101 = vector.shape_cast %100 : vector<32xf32> to vector<1x32xf32>
    %c2_i32 = arith.constant 2 : i32
    %102 = vector.broadcast %c2_i32 : i32 to vector<20x32xi32>
    %103 = arith.cmpi eq, %47, %102 : vector<20x32xi32>
    %104 = vector.shape_cast %97 : vector<1x32xf32> to vector<1x32xf32>
    %105 = vector.broadcast %104 : vector<1x32xf32> to vector<20x32xf32>
    %106 = arith.select %103, %105, %90 : vector<20x32xi1>, vector<20x32xf32>
    %c12_i32 = arith.constant 12 : i32
    %107 = vector.broadcast %c12_i32 : i32 to vector<20x32xi32>
    %108 = arith.cmpi eq, %47, %107 : vector<20x32xi32>
    %109 = vector.shape_cast %101 : vector<1x32xf32> to vector<1x32xf32>
    %110 = vector.broadcast %109 : vector<1x32xf32> to vector<20x32xf32>
    %111 = arith.select %108, %110, %106 : vector<20x32xi1>, vector<20x32xf32>
    %cst_37 = arith.constant 3.000000e+00 : f32
    %112 = vector.broadcast %cst_37 : f32 to vector<16x32xf32>
    %113 = arith.cmpf oeq, %33, %112 : vector<16x32xf32>
    %cst_38 = arith.constant 1.000000e+00 : f32
    %cst_39 = arith.constant 0.000000e+00 : f32
    %114 = vector.broadcast %cst_38 : f32 to vector<16x32xf32>
    %115 = vector.broadcast %cst_39 : f32 to vector<16x32xf32>
    %116 = arith.select %113, %114, %115 : vector<16x32xi1>, vector<16x32xf32>
    %cst_40 = arith.constant dense<0.000000e+00> : vector<32xf32>
    %117 = vector.multi_reduction <add>, %116, %cst_40 [0] : vector<16x32xf32> to vector<32xf32>
    %118 = vector.shape_cast %117 : vector<32xf32> to vector<1x32xf32>
    %cst_41 = arith.constant 0.000000e+00 : f32
    %119 = vector.broadcast %cst_41 : f32 to vector<16x32xf32>
    %120 = arith.select %113, %46, %119 : vector<16x32xi1>, vector<16x32xf32>
    %cst_42 = arith.constant dense<0.000000e+00> : vector<32xf32>
    %121 = vector.multi_reduction <add>, %120, %cst_42 [0] : vector<16x32xf32> to vector<32xf32>
    %122 = vector.shape_cast %121 : vector<32xf32> to vector<1x32xf32>
    %c3_i32 = arith.constant 3 : i32
    %123 = vector.broadcast %c3_i32 : i32 to vector<20x32xi32>
    %124 = arith.cmpi eq, %47, %123 : vector<20x32xi32>
    %125 = vector.shape_cast %118 : vector<1x32xf32> to vector<1x32xf32>
    %126 = vector.broadcast %125 : vector<1x32xf32> to vector<20x32xf32>
    %127 = arith.select %124, %126, %111 : vector<20x32xi1>, vector<20x32xf32>
    %c13_i32 = arith.constant 13 : i32
    %128 = vector.broadcast %c13_i32 : i32 to vector<20x32xi32>
    %129 = arith.cmpi eq, %47, %128 : vector<20x32xi32>
    %130 = vector.shape_cast %122 : vector<1x32xf32> to vector<1x32xf32>
    %131 = vector.broadcast %130 : vector<1x32xf32> to vector<20x32xf32>
    %132 = arith.select %129, %131, %127 : vector<20x32xi1>, vector<20x32xf32>
    %cst_43 = arith.constant 4.000000e+00 : f32
    %133 = vector.broadcast %cst_43 : f32 to vector<16x32xf32>
    %134 = arith.cmpf oeq, %33, %133 : vector<16x32xf32>
    %cst_44 = arith.constant 1.000000e+00 : f32
    %cst_45 = arith.constant 0.000000e+00 : f32
    %135 = vector.broadcast %cst_44 : f32 to vector<16x32xf32>
    %136 = vector.broadcast %cst_45 : f32 to vector<16x32xf32>
    %137 = arith.select %134, %135, %136 : vector<16x32xi1>, vector<16x32xf32>
    %cst_46 = arith.constant dense<0.000000e+00> : vector<32xf32>
    %138 = vector.multi_reduction <add>, %137, %cst_46 [0] : vector<16x32xf32> to vector<32xf32>
    %139 = vector.shape_cast %138 : vector<32xf32> to vector<1x32xf32>
    %cst_47 = arith.constant 0.000000e+00 : f32
    %140 = vector.broadcast %cst_47 : f32 to vector<16x32xf32>
    %141 = arith.select %134, %46, %140 : vector<16x32xi1>, vector<16x32xf32>
    %cst_48 = arith.constant dense<0.000000e+00> : vector<32xf32>
    %142 = vector.multi_reduction <add>, %141, %cst_48 [0] : vector<16x32xf32> to vector<32xf32>
    %143 = vector.shape_cast %142 : vector<32xf32> to vector<1x32xf32>
    %c4_i32 = arith.constant 4 : i32
    %144 = vector.broadcast %c4_i32 : i32 to vector<20x32xi32>
    %145 = arith.cmpi eq, %47, %144 : vector<20x32xi32>
    %146 = vector.shape_cast %139 : vector<1x32xf32> to vector<1x32xf32>
    %147 = vector.broadcast %146 : vector<1x32xf32> to vector<20x32xf32>
    %148 = arith.select %145, %147, %132 : vector<20x32xi1>, vector<20x32xf32>
    %c14_i32 = arith.constant 14 : i32
    %149 = vector.broadcast %c14_i32 : i32 to vector<20x32xi32>
    %150 = arith.cmpi eq, %47, %149 : vector<20x32xi32>
    %151 = vector.shape_cast %143 : vector<1x32xf32> to vector<1x32xf32>
    %152 = vector.broadcast %151 : vector<1x32xf32> to vector<20x32xf32>
    %153 = arith.select %150, %152, %148 : vector<20x32xi1>, vector<20x32xf32>
    %cst_49 = arith.constant 5.000000e+00 : f32
    %154 = vector.broadcast %cst_49 : f32 to vector<16x32xf32>
    %155 = arith.cmpf oeq, %33, %154 : vector<16x32xf32>
    %cst_50 = arith.constant 1.000000e+00 : f32
    %cst_51 = arith.constant 0.000000e+00 : f32
    %156 = vector.broadcast %cst_50 : f32 to vector<16x32xf32>
    %157 = vector.broadcast %cst_51 : f32 to vector<16x32xf32>
    %158 = arith.select %155, %156, %157 : vector<16x32xi1>, vector<16x32xf32>
    %cst_52 = arith.constant dense<0.000000e+00> : vector<32xf32>
    %159 = vector.multi_reduction <add>, %158, %cst_52 [0] : vector<16x32xf32> to vector<32xf32>
    %160 = vector.shape_cast %159 : vector<32xf32> to vector<1x32xf32>
    %cst_53 = arith.constant 0.000000e+00 : f32
    %161 = vector.broadcast %cst_53 : f32 to vector<16x32xf32>
    %162 = arith.select %155, %46, %161 : vector<16x32xi1>, vector<16x32xf32>
    %cst_54 = arith.constant dense<0.000000e+00> : vector<32xf32>
    %163 = vector.multi_reduction <add>, %162, %cst_54 [0] : vector<16x32xf32> to vector<32xf32>
    %164 = vector.shape_cast %163 : vector<32xf32> to vector<1x32xf32>
    %c5_i32 = arith.constant 5 : i32
    %165 = vector.broadcast %c5_i32 : i32 to vector<20x32xi32>
    %166 = arith.cmpi eq, %47, %165 : vector<20x32xi32>
    %167 = vector.shape_cast %160 : vector<1x32xf32> to vector<1x32xf32>
    %168 = vector.broadcast %167 : vector<1x32xf32> to vector<20x32xf32>
    %169 = arith.select %166, %168, %153 : vector<20x32xi1>, vector<20x32xf32>
    %c15_i32 = arith.constant 15 : i32
    %170 = vector.broadcast %c15_i32 : i32 to vector<20x32xi32>
    %171 = arith.cmpi eq, %47, %170 : vector<20x32xi32>
    %172 = vector.shape_cast %164 : vector<1x32xf32> to vector<1x32xf32>
    %173 = vector.broadcast %172 : vector<1x32xf32> to vector<20x32xf32>
    %174 = arith.select %171, %173, %169 : vector<20x32xi1>, vector<20x32xf32>
    %cst_55 = arith.constant 6.000000e+00 : f32
    %175 = vector.broadcast %cst_55 : f32 to vector<16x32xf32>
    %176 = arith.cmpf oeq, %33, %175 : vector<16x32xf32>
    %cst_56 = arith.constant 1.000000e+00 : f32
    %cst_57 = arith.constant 0.000000e+00 : f32
    %177 = vector.broadcast %cst_56 : f32 to vector<16x32xf32>
    %178 = vector.broadcast %cst_57 : f32 to vector<16x32xf32>
    %179 = arith.select %176, %177, %178 : vector<16x32xi1>, vector<16x32xf32>
    %cst_58 = arith.constant dense<0.000000e+00> : vector<32xf32>
    %180 = vector.multi_reduction <add>, %179, %cst_58 [0] : vector<16x32xf32> to vector<32xf32>
    %181 = vector.shape_cast %180 : vector<32xf32> to vector<1x32xf32>
    %cst_59 = arith.constant 0.000000e+00 : f32
    %182 = vector.broadcast %cst_59 : f32 to vector<16x32xf32>
    %183 = arith.select %176, %46, %182 : vector<16x32xi1>, vector<16x32xf32>
    %cst_60 = arith.constant dense<0.000000e+00> : vector<32xf32>
    %184 = vector.multi_reduction <add>, %183, %cst_60 [0] : vector<16x32xf32> to vector<32xf32>
    %185 = vector.shape_cast %184 : vector<32xf32> to vector<1x32xf32>
    %c6_i32 = arith.constant 6 : i32
    %186 = vector.broadcast %c6_i32 : i32 to vector<20x32xi32>
    %187 = arith.cmpi eq, %47, %186 : vector<20x32xi32>
    %188 = vector.shape_cast %181 : vector<1x32xf32> to vector<1x32xf32>
    %189 = vector.broadcast %188 : vector<1x32xf32> to vector<20x32xf32>
    %190 = arith.select %187, %189, %174 : vector<20x32xi1>, vector<20x32xf32>
    %c16_i32_61 = arith.constant 16 : i32
    %191 = vector.broadcast %c16_i32_61 : i32 to vector<20x32xi32>
    %192 = arith.cmpi eq, %47, %191 : vector<20x32xi32>
    %193 = vector.shape_cast %185 : vector<1x32xf32> to vector<1x32xf32>
    %194 = vector.broadcast %193 : vector<1x32xf32> to vector<20x32xf32>
    %195 = arith.select %192, %194, %190 : vector<20x32xi1>, vector<20x32xf32>
    %cst_62 = arith.constant 7.000000e+00 : f32
    %196 = vector.broadcast %cst_62 : f32 to vector<16x32xf32>
    %197 = arith.cmpf oeq, %33, %196 : vector<16x32xf32>
    %cst_63 = arith.constant 1.000000e+00 : f32
    %cst_64 = arith.constant 0.000000e+00 : f32
    %198 = vector.broadcast %cst_63 : f32 to vector<16x32xf32>
    %199 = vector.broadcast %cst_64 : f32 to vector<16x32xf32>
    %200 = arith.select %197, %198, %199 : vector<16x32xi1>, vector<16x32xf32>
    %cst_65 = arith.constant dense<0.000000e+00> : vector<32xf32>
    %201 = vector.multi_reduction <add>, %200, %cst_65 [0] : vector<16x32xf32> to vector<32xf32>
    %202 = vector.shape_cast %201 : vector<32xf32> to vector<1x32xf32>
    %cst_66 = arith.constant 0.000000e+00 : f32
    %203 = vector.broadcast %cst_66 : f32 to vector<16x32xf32>
    %204 = arith.select %197, %46, %203 : vector<16x32xi1>, vector<16x32xf32>
    %cst_67 = arith.constant dense<0.000000e+00> : vector<32xf32>
    %205 = vector.multi_reduction <add>, %204, %cst_67 [0] : vector<16x32xf32> to vector<32xf32>
    %206 = vector.shape_cast %205 : vector<32xf32> to vector<1x32xf32>
    %c7_i32 = arith.constant 7 : i32
    %207 = vector.broadcast %c7_i32 : i32 to vector<20x32xi32>
    %208 = arith.cmpi eq, %47, %207 : vector<20x32xi32>
    %209 = vector.shape_cast %202 : vector<1x32xf32> to vector<1x32xf32>
    %210 = vector.broadcast %209 : vector<1x32xf32> to vector<20x32xf32>
    %211 = arith.select %208, %210, %195 : vector<20x32xi1>, vector<20x32xf32>
    %c17_i32 = arith.constant 17 : i32
    %212 = vector.broadcast %c17_i32 : i32 to vector<20x32xi32>
    %213 = arith.cmpi eq, %47, %212 : vector<20x32xi32>
    %214 = vector.shape_cast %206 : vector<1x32xf32> to vector<1x32xf32>
    %215 = vector.broadcast %214 : vector<1x32xf32> to vector<20x32xf32>
    %216 = arith.select %213, %215, %211 : vector<20x32xi1>, vector<20x32xf32>
    %cst_68 = arith.constant 8.000000e+00 : f32
    %217 = vector.broadcast %cst_68 : f32 to vector<16x32xf32>
    %218 = arith.cmpf oeq, %33, %217 : vector<16x32xf32>
    %cst_69 = arith.constant 1.000000e+00 : f32
    %cst_70 = arith.constant 0.000000e+00 : f32
    %219 = vector.broadcast %cst_69 : f32 to vector<16x32xf32>
    %220 = vector.broadcast %cst_70 : f32 to vector<16x32xf32>
    %221 = arith.select %218, %219, %220 : vector<16x32xi1>, vector<16x32xf32>
    %cst_71 = arith.constant dense<0.000000e+00> : vector<32xf32>
    %222 = vector.multi_reduction <add>, %221, %cst_71 [0] : vector<16x32xf32> to vector<32xf32>
    %223 = vector.shape_cast %222 : vector<32xf32> to vector<1x32xf32>
    %cst_72 = arith.constant 0.000000e+00 : f32
    %224 = vector.broadcast %cst_72 : f32 to vector<16x32xf32>
    %225 = arith.select %218, %46, %224 : vector<16x32xi1>, vector<16x32xf32>
    %cst_73 = arith.constant dense<0.000000e+00> : vector<32xf32>
    %226 = vector.multi_reduction <add>, %225, %cst_73 [0] : vector<16x32xf32> to vector<32xf32>
    %227 = vector.shape_cast %226 : vector<32xf32> to vector<1x32xf32>
    %c8_i32 = arith.constant 8 : i32
    %228 = vector.broadcast %c8_i32 : i32 to vector<20x32xi32>
    %229 = arith.cmpi eq, %47, %228 : vector<20x32xi32>
    %230 = vector.shape_cast %223 : vector<1x32xf32> to vector<1x32xf32>
    %231 = vector.broadcast %230 : vector<1x32xf32> to vector<20x32xf32>
    %232 = arith.select %229, %231, %216 : vector<20x32xi1>, vector<20x32xf32>
    %c18_i32 = arith.constant 18 : i32
    %233 = vector.broadcast %c18_i32 : i32 to vector<20x32xi32>
    %234 = arith.cmpi eq, %47, %233 : vector<20x32xi32>
    %235 = vector.shape_cast %227 : vector<1x32xf32> to vector<1x32xf32>
    %236 = vector.broadcast %235 : vector<1x32xf32> to vector<20x32xf32>
    %237 = arith.select %234, %236, %232 : vector<20x32xi1>, vector<20x32xf32>
    %cst_74 = arith.constant 9.000000e+00 : f32
    %238 = vector.broadcast %cst_74 : f32 to vector<16x32xf32>
    %239 = arith.cmpf oeq, %33, %238 : vector<16x32xf32>
    %cst_75 = arith.constant 1.000000e+00 : f32
    %cst_76 = arith.constant 0.000000e+00 : f32
    %240 = vector.broadcast %cst_75 : f32 to vector<16x32xf32>
    %241 = vector.broadcast %cst_76 : f32 to vector<16x32xf32>
    %242 = arith.select %239, %240, %241 : vector<16x32xi1>, vector<16x32xf32>
    %cst_77 = arith.constant dense<0.000000e+00> : vector<32xf32>
    %243 = vector.multi_reduction <add>, %242, %cst_77 [0] : vector<16x32xf32> to vector<32xf32>
    %244 = vector.shape_cast %243 : vector<32xf32> to vector<1x32xf32>
    %cst_78 = arith.constant 0.000000e+00 : f32
    %245 = vector.broadcast %cst_78 : f32 to vector<16x32xf32>
    %246 = arith.select %239, %46, %245 : vector<16x32xi1>, vector<16x32xf32>
    %cst_79 = arith.constant dense<0.000000e+00> : vector<32xf32>
    %247 = vector.multi_reduction <add>, %246, %cst_79 [0] : vector<16x32xf32> to vector<32xf32>
    %248 = vector.shape_cast %247 : vector<32xf32> to vector<1x32xf32>
    %c9_i32 = arith.constant 9 : i32
    %249 = vector.broadcast %c9_i32 : i32 to vector<20x32xi32>
    %250 = arith.cmpi eq, %47, %249 : vector<20x32xi32>
    %251 = vector.shape_cast %244 : vector<1x32xf32> to vector<1x32xf32>
    %252 = vector.broadcast %251 : vector<1x32xf32> to vector<20x32xf32>
    %253 = arith.select %250, %252, %237 : vector<20x32xi1>, vector<20x32xf32>
    %c19_i32 = arith.constant 19 : i32
    %254 = vector.broadcast %c19_i32 : i32 to vector<20x32xi32>
    %255 = arith.cmpi eq, %47, %254 : vector<20x32xi32>
    %256 = vector.shape_cast %248 : vector<1x32xf32> to vector<1x32xf32>
    %257 = vector.broadcast %256 : vector<1x32xf32> to vector<20x32xf32>
    %258 = arith.select %255, %257, %253 : vector<20x32xi1>, vector<20x32xf32>
    %c0_80 = arith.constant 0 : index
    %c0_81 = arith.constant 0 : index
    %c0_82 = arith.constant 0 : index
    %259 = vector.load %arg5[%c0_80, %c0_81, %c0_82] : memref<1x20x32xf32, #tpu.memory_space<vmem>>, vector<1x20x32xf32>
    %260 = vector.shape_cast %258 : vector<20x32xf32> to vector<1x20x32xf32>
    %261 = arith.addf %259, %260 : vector<1x20x32xf32>
    %c0_83 = arith.constant 0 : index
    %c0_84 = arith.constant 0 : index
    %c0_85 = arith.constant 0 : index
    %262 = vector.load %arg5[%c0_83, %c0_84, %c0_85] : memref<1x20x32xf32, #tpu.memory_space<vmem>>, vector<1x20x32xf32>
    tpu.vector_store %arg5[%c0_83, %c0_84, %c0_85], %261 {strides = array<i32>} : memref<1x20x32xf32, #tpu.memory_space<vmem>>, vector<1x20x32xf32>,
    return
  }
  func.func @transform_0(%arg0: i32, %arg1: i32) -> (i32, i32) {
    %c1_i32 = arith.constant 1 : i32
    %0 = arith.muli %arg0, %c1_i32 : i32
    %1 = arith.addi %0, %arg1 : i32
    %c0_i32 = arith.constant 0 : i32
    %2 = arith.minsi %1, %c0_i32 : i32
    %c0_i32_0 = arith.constant 0 : i32
    %c0_i32_1 = arith.constant 0 : i32
    return %2, %c0_i32_0 : i32, i32
  }
  func.func @transform_1(%arg0: i32, %arg1: i32) -> (i32, i32) {
    %c1_i32 = arith.constant 1 : i32
    %0 = arith.muli %arg0, %c1_i32 : i32
    %1 = arith.addi %0, %arg1 : i32
    %c0_i32 = arith.constant 0 : i32
    %2 = arith.minsi %1, %c0_i32 : i32
    %c0_i32_0 = arith.constant 0 : i32
    %c0_i32_1 = arith.constant 0 : i32
    return %2, %c0_i32_0 : i32, i32
  }
  func.func @transform_2(%arg0: i32, %arg1: i32) -> (i32, i32) {
    %c1_i32 = arith.constant 1 : i32
    %0 = arith.muli %arg0, %c1_i32 : i32
    %1 = arith.addi %0, %arg1 : i32
    %c0_i32 = arith.constant 0 : i32
    %2 = arith.minsi %1, %c0_i32 : i32
    %c0_i32_0 = arith.constant 0 : i32
    %c0_i32_1 = arith.constant 0 : i32
    return %2, %c0_i32_0 : i32, i32
  }
  func.func @transform_3(%arg0: i32, %arg1: i32) -> (i32, i32, i32) {
    %c0_i32 = arith.constant 0 : i32
    %c0_i32_0 = arith.constant 0 : i32
    %c0_i32_1 = arith.constant 0 : i32
    return %arg0, %c0_i32, %c0_i32_0 : i32, i32, i32
  }
}

</mosaic_0001>

<bundles_post_ra>
// kernel: ghmc_loss.1
= control target key start
LH: loop header
LB: loop body
LE: loop exit
PB: predicated region body
PF: predicated region fallthrough
CT: control target
= control target key end

     0   :  { %8 = vsyncpa [#allocation3], 0  ;;  %s1011_s0 = inlined_call_operand.hbm [shape: f32[16,32], index: 0, kind: input, shape index: {}]   ;;  %s1012_s1 = inlined_call_operand.hbm [shape: f32[16,32], index: 1, kind: input, shape index: {}]   ;;  %s1013_s2 = inlined_call_operand.hbm [shape: f32[16,32], index: 2, kind: input, shape index: {}]   ;;  %s1014_s3 = inlined_call_operand.vmem [shape: f32[1,20,32], index: 3, kind: output, shape index: {}]  }
   0x1   :  { %9 = vsyncpa [#allocation5], 0  ;;  %s39_s14 = sshll.u32 %s1012_s1, 4  ;;  %s674_s15 = smov [#allocation4]   ;;  %s40_s14 = int_to_ptr.hbm [resolvable:$true] %s39_s14 }
   0x2   :  { %s41_s16 = sshll.u32 %s674_s15, 4  ;;  %s20_s19 = sshll.u32 %s1011_s0, 4  ;;  %s42_s16 = int_to_ptr.vmem [resolvable:$true] %s41_s16  ;;  %s21_s19 = int_to_ptr.hbm [resolvable:$true] %s20_s19 }
   0x3   :  { %s675_s20 = smov 128   ;;  %s676_s21 = smov 8  }
   0x4   :  { %47 = dma.hbm_to_vmem [thread:$0]  %s40_s14, 256, %s42_s16, [#allocation5], %s675_s20, %s675_s20, %s676_s21  }
   0x5   :  { %s677_s22 = smov [#allocation2]   ;;  %s58_s26 = sshll.u32 %s1013_s2, 4  ;;  %s59_s26 = int_to_ptr.hbm [resolvable:$true] %s58_s26 }
   0x6   :  { %s22_s23 = sshll.u32 %s677_s22, 4  ;;  %s678_s1 = smov [#allocation6]   ;;  %s23_s23 = int_to_ptr.vmem [resolvable:$true] %s22_s23 }
   0x7   :  { %28 = dma.hbm_to_vmem [thread:$0]  %s21_s19, 256, %s23_s23, [#allocation3], %s675_s20, %s675_s20, %s676_s21  }
   0x8   :  { %s60_s27 = sshll.u32 %s678_s1, 4  ;;  %s61_s27 = int_to_ptr.vmem [resolvable:$true] %s60_s27 }
   0x9   :  { %66 = dma.hbm_to_vmem [thread:$0]  %s59_s26, 256, %s61_s27, [#allocation5], %s675_s20, %s675_s20, %s676_s21  }
   0xa   :  { %670 = dma.done.wait [#allocation3], 256  }
   0xb   :  { %671 = vsyncadd [#allocation3], 4294967040 }
   0xc   :  { %672 = dma.done.wait [#allocation5], 512  }
   0xd   :  { %673 = vsyncadd [#allocation5], 4294966784  ;;  %vm95_vm0 = vcmask 261120   ;;  %vm1015_vm1 = vcmask 257024   ;;  %v679_v0 = vmov 0.0   ;;  %v724_v1 = vld [vmem:[#allocation2] sm:$0xff]  ;;  %v108_v43 = vlaneseq }
   0xe   :  { %96 = vst.msk [vmem:[%s1014_s3] sm:$0xff] %vm95_vm0, %v679_v0  ;;  %v726_v2 = vld [vmem:[#allocation2 + $0x8] sm:$0xff]  ;;  %v578_v3 = vmul.f32 -1.442695, %v724_v1  ;;  %v102_v24 = vld [vmem:[#allocation4] sm:$0xff]  ;;  %v103_v26 = vld [vmem:[#allocation4 + $0x8] sm:$0xff] }
   0xf   :  { %97 = vst.msk [vmem:[%s1014_s3 + $0x8] sm:$0xff] %vm95_vm0, %v679_v0  ;;  %v579_v4 = vmul.f32 -1.442695, %v726_v2  ;;  %vm174_vm10 = vcmp.ge.f32.partialorder %v724_v1, 0.0  ;;  %vm175_vm11 = vcmp.ge.f32.partialorder %v726_v2, 0.0  ;;  %v104_v33 = vld [vmem:[#allocation6] sm:$0xff]  ;;  %v188_v48 = vmul.f32 %v102_v24, %v724_v1 }
  0x10   :  { %99 = vst.msk [vmem:[%s1014_s3 + $0x10] sm:$0xf] %vm1015_vm1, %v679_v0  ;;  %586 = vpow2.f32 %v578_v3  ;;  %v105_v36 = vld [vmem:[#allocation6 + $0x8] sm:$0xff]  ;;  %vm158_vm12 = vcmp.gt.f32.partialorder %v104_v33, 0.0  ;;  %v186_v47 = vmax.f32 %v724_v1, 0.0  ;;  %v187_v51 = vmax.f32 %v726_v2, 0.0 }
  0x11   :  { %588 = vpow2.f32 %v579_v4  ;;  %vm159_vm14 = vcmp.gt.f32.partialorder %v105_v36, 0.0  ;;  %v189_v52 = vmul.f32 %v103_v26, %v726_v2  ;;  %v736_v54 = vshrl.u32 %v108_v43, 7 }
  0x12   :  { %v748_v59 = vsub.f32 %v186_v47, %v188_v48 }
  0x13   :  { %v755_v61 = vsub.f32 %v187_v51, %v189_v52 }
  0x16   :  { %v587_v5 = vpop.eup %586 }
  0x17   :  { %v589_v6 = vpop.eup %588  ;;  %v122_v7 = vadd.f32 1.0, %v587_v5 }
  0x18   :  { %v123_v8 = vadd.f32 1.0, %v589_v6 }
  0x19   :  { %590 = vrcp.f32 %v122_v7  ;;  %vm129_vm2 = vweird.f32 %v122_v7  ;;  %v135_v12 = vand.u32 2147483648, %v122_v7  ;;  %v133_v15 = vand.u32 2147483647, %v122_v7 }
  0x1a   :  { %592 = vrcp.f32 %v123_v8  ;;  %v150_v16 = vand.u32 2147483648, %v123_v8  ;;  %vm144_vm4 = vweird.f32 %v123_v8  ;;  %v148_v18 = vand.u32 2147483647, %v123_v8 }
  0x1b   :  { %v136_v20 = vor.u32 1.1754944e-38, %v135_v12  ;;  %vm134_vm7 = vcmp.eq.f32.partialorder %v133_v15, 8.507059e+37 }
  0x1c   :  { %v151_v23 = vor.u32 1.1754944e-38, %v150_v16  ;;  %vm149_vm9 = vcmp.eq.f32.partialorder %v148_v18, 8.507059e+37 }
  0x1f   :  { %v591_v9 = vpop.eup %590 }
  0x20   :  { %v593_v10 = vpop.eup %592  ;;  %v125_v11 = vmul.f32 %v591_v9, %v122_v7  ;;  %vm130_vm3 = vweird.f32 %v591_v9 }
  0x21   :  { %v140_v13 = vmul.f32 %v593_v10, %v123_v8  ;;  %vm145_vm5 = vweird.f32 %v593_v10  ;;  %vm131_vm6 = vmor %vm129_vm2, %vm130_vm3 }
  0x22   :  { %v126_v14 = vsub.f32 1.0, %v125_v11  ;;  %vm146_vm8 = vmor %vm144_vm4, %vm145_vm5 }
  0x23   :  { %v141_v17 = vsub.f32 1.0, %v140_v13 }
  0x24   :  { %v127_v19 = vmul.f32 %v591_v9, %v126_v14 }
  0x25   :  { %v142_v21 = vmul.f32 %v593_v10, %v141_v17 }
  0x26   :  { %v128_v22 = vadd.f32 %v591_v9, %v127_v19 }
  0x27   :  { %v143_v25 = vadd.f32 %v593_v10, %v142_v21 }
  0x28   :  { %v132_v27 = vsel %vm131_vm6, %v591_v9, %v128_v22 }
  0x29   :  { %v137_v28 = vsel %vm134_vm7, %v136_v20, %v132_v27  ;;  %v147_v29 = vsel %vm146_vm8, %v593_v10, %v143_v25 }
  0x2a   :  { %v152_v30 = vsel %vm149_vm9, %v151_v23, %v147_v29  ;;  %v154_v31 = vsub.f32 %v137_v28, %v102_v24  ;;  %v176_v32 = vsub.f32 1.0, %v137_v28 }
  0x2b   :  { %v155_v34 = vsub.f32 %v152_v30, %v103_v26  ;;  %v177_v35 = vsub.f32 1.0, %v152_v30 }
  0x2c   :  { %v156_v37 = vand.u32 2147483647, %v154_v31  ;;  %v178_v38 = vsel %vm174_vm10, %v137_v28, %v176_v32 }
  0x2d   :  { %v157_v39 = vand.u32 2147483647, %v155_v34  ;;  %v179_v40 = vsel %vm175_vm11, %v152_v30, %v177_v35  ;;  %594 = vlog2.f32 %v178_v38 }
  0x2e   :  { %vm160_vm13 = vcmp.lt.f32.partialorder %v156_v37, 1.000001  ;;  %v166_v41 = vmul.f32 10.0, %v156_v37  ;;  %596 = vlog2.f32 %v179_v40 }
  0x2f   :  { %vm161_vm15 = vcmp.lt.f32.partialorder %v157_v39, 1.000001  ;;  %v167_v42 = vmul.f32 10.0, %v157_v39  ;;  %vm162_vm2 = vmand %vm158_vm12, %vm160_vm13  ;;  %vm220_vm12 = vcmp.eq.s32.totalorder %v736_v54, 0  ;;  %vm256_vm13 = vcmp.eq.s32.totalorder %v736_v54, 1 }
  0x30   :  { %v168_v44 = vfloor.f32 %v166_v41  ;;  %vm163_vm3 = vmand %vm159_vm14, %vm161_vm15 }
  0x31   :  { %v169_v45 = vfloor.f32 %v167_v42 }
  0x32   :  { %v170_v46 = vmin.f32 %v168_v44, 9.0 }
  0x33   :  { %v595_v49 = vpop.eup %594  ;;  %v171_v50 = vmin.f32 %v169_v45, 9.0 }
  0x34   :  { %v597_v53 = vpop.eup %596  ;;  %v738_v55 = vsel %vm162_vm2, %v170_v46, -1.0  ;;  %v740_v56 = vmul.f32 0.6931472, %v595_v49  ;;  %vm292_vm2 = vcmp.eq.s32.totalorder %v736_v54, 2 }
  0x35   :  { %v742_v57 = vsel %vm163_vm3, %v171_v50, -1.0  ;;  %v744_v58 = vmul.f32 0.6931472, %v597_v53  ;;  %vm195_vm4 = vcmp.eq.f32.partialorder %v738_v55, 0.0  ;;  %vm232_vm5 = vcmp.eq.f32.partialorder %v738_v55, 1.0 }
  0x36   :  { %vm196_vm6 = vcmp.eq.f32.partialorder %v742_v57, 0.0  ;;  %v197_v60 = vsel %vm195_vm4, 1.0, %v679_v0  ;;  %vm233_vm7 = vcmp.eq.f32.partialorder %v742_v57, 1.0  ;;  %v234_v1 = vsel %vm232_vm5, 1.0, %v679_v0 }
  0x37   :  { %v198_v62 = vsel %vm196_vm6, 1.0, %v679_v0  ;;  %v200_v63 = vsel %vm95_vm0, %v197_v60, 0.0  ;;  %v184_v2 = vsub.f32 0.0, %v740_v56  ;;  %v235_v4 = vsel %vm233_vm7, 1.0, %v679_v0 }
  0x38   :  { %v201_v3 = vsel %vm95_vm0, %v198_v62, 0.0  ;;  %v236_v5 = vsel %vm95_vm0, %v234_v1, 0.0  ;;  %v185_v6 = vsub.f32 0.0, %v744_v58  ;;  %v237_v8 = vsel %vm95_vm0, %v235_v4, 0.0 }
  0x39   :  { %v202_v7 = vadd.f32 %v201_v3, %v200_v63  ;;  %vm268_vm8 = vcmp.eq.f32.partialorder %v738_v55, 2.0  ;;  %v238_v9 = vadd.f32 %v237_v8, %v236_v5  ;;  %vm269_vm9 = vcmp.eq.f32.partialorder %v742_v57, 2.0 }
  0x3a   :  { %v270_v10 = vsel %vm268_vm8, 1.0, %v679_v0  ;;  %vm304_vm10 = vcmp.eq.f32.partialorder %v738_v55, 3.0  ;;  %v271_v12 = vsel %vm269_vm9, 1.0, %v679_v0  ;;  %vm305_vm11 = vcmp.eq.f32.partialorder %v742_v57, 3.0 }
  0x3b   :  { %v203_v11 = vrot.slane %v202_v7, 4  ;;  %v272_v13 = vsel %vm95_vm0, %v270_v10, 0.0  ;;  %v239_v14 = vrot.slane %v238_v9, 4  ;;  %v273_v15 = vsel %vm95_vm0, %v271_v12, 0.0 }
  0x3c   :  { %v306_v16 = vsel %vm304_vm10, 1.0, %v679_v0  ;;  %v307_v17 = vsel %vm305_vm11, 1.0, %v679_v0  ;;  %v274_v19 = vadd.f32 %v273_v15, %v272_v13  ;;  %vm1018_vm14 = vcmp.eq.f32.partialorder %v738_v55, 4.0 }
  0x3d   :  { %v204_v18 = vadd.f32 %v203_v11, %v202_v7  ;;  %v308_v20 = vsel %vm95_vm0, %v306_v16, 0.0  ;;  %v309_v21 = vsel %vm95_vm0, %v307_v17, 0.0  ;;  %v240_v22 = vadd.f32 %v239_v14, %v238_v9 }
  0x3e   :  { %v310_v23 = vadd.f32 %v309_v21, %v308_v20  ;;  %vm1016_vm15 = vcmp.eq.f32.partialorder %v742_v57, 4.0  ;;  %v275_v25 = vrot.slane %v274_v19, 4  ;;  %v342_v26 = vsel %vm1018_vm14, 1.0, %v679_v0 }
  0x3f   :  { %v205_v24 = vrot.slane %v204_v18, 2  ;;  %v343_v27 = vsel %vm1016_vm15, 1.0, %v679_v0  ;;  %v241_v28 = vrot.slane %v240_v22, 2  ;;  %v344_v30 = vsel %vm95_vm0, %v342_v26, 0.0 }
  0x40   :  { %v311_v29 = vrot.slane %v310_v23, 4  ;;  %v345_v31 = vsel %vm95_vm0, %v343_v27, 0.0  ;;  %v276_v33 = vadd.f32 %v275_v25, %v274_v19  ;;  %vm1017_vm3 = vcmp.eq.f32.partialorder %v738_v55, 5.0 }
  0x41   :  { %v206_v32 = vadd.f32 %v205_v24, %v204_v18  ;;  %v346_v34 = vadd.f32 %v345_v31, %v344_v30  ;;  %v242_v35 = vadd.f32 %v241_v28, %v240_v22  ;;  %vm377_vm1 = vcmp.eq.f32.partialorder %v742_v57, 5.0 }
  0x42   :  { %v312_v36 = vadd.f32 %v311_v29, %v310_v23  ;;  %v378_v37 = vsel %vm1017_vm3, 1.0, %v679_v0  ;;  %v277_v39 = vrot.slane %v276_v33, 2  ;;  %vm328_vm15 = vcmp.eq.s32.totalorder %v736_v54, 3 }
  0x43   :  { %v207_v38 = vrot.slane %v206_v32, 1  ;;  %v347_v40 = vrot.slane %v346_v34, 4  ;;  %v379_v41 = vsel %vm377_vm1, 1.0, %v679_v0  ;;  %v243_v42 = vrot.slane %v242_v35, 1 }
  0x44   :  { %v313_v43 = vrot.slane %v312_v36, 2  ;;  %v380_v44 = vsel %vm95_vm0, %v378_v37, 0.0  ;;  %v381_v45 = vsel %vm95_vm0, %v379_v41, 0.0  ;;  %v278_v47 = vadd.f32 %v277_v39, %v276_v33 }
  0x45   :  { %v208_v46 = vadd.f32 %v207_v38, %v206_v32  ;;  %v348_v48 = vadd.f32 %v347_v40, %v346_v34  ;;  %v382_v49 = vadd.f32 %v381_v45, %v380_v44  ;;  %v244_v50 = vadd.f32 %v243_v42, %v242_v35 }
  0x46   :  { %v314_v51 = vadd.f32 %v313_v43, %v312_v36  ;;  %vm412_vm3 = vcmp.eq.f32.partialorder %v738_v55, 6.0  ;;  %vm1019_vm14 = vcmp.eq.f32.partialorder %v742_v57, 6.0  ;;  %v279_v53 = vrot.slane %v278_v47, 1 }
  0x47   :  { %v223_v52 = vsel %vm220_vm12, %v208_v46, 0.0  ;;  %v349_v60 = vrot.slane %v348_v48, 2  ;;  %v383_v62 = vrot.slane %v382_v49, 4  ;;  %v414_v3 = vsel %vm412_vm3, 1.0, %v679_v0 }
  0x48   :  { %v259_v63 = vsel %vm256_vm13, %v244_v50, %v223_v52  ;;  %v315_v1 = vrot.slane %v314_v51, 1  ;;  %v415_v4 = vsel %vm1019_vm14, 1.0, %v679_v0  ;;  %v280_v5 = vadd.f32 %v279_v53, %v278_v47 }
  0x49   :  { %v350_v7 = vadd.f32 %v349_v60, %v348_v48  ;;  %v384_v8 = vadd.f32 %v383_v62, %v382_v49  ;;  %v416_v9 = vsel %vm95_vm0, %v414_v3, 0.0  ;;  %v832_v10 = vadd.f32 %v748_v59, %v184_v2 }
  0x4a   :  { %v316_v11 = vadd.f32 %v315_v1, %v314_v51  ;;  %v417_v12 = vsel %vm95_vm0, %v415_v4, 0.0  ;;  %vm448_vm12 = vcmp.eq.f32.partialorder %v738_v55, 7.0  ;;  %v295_v13 = vsel %vm292_vm2, %v280_v5, %v259_v63 }
  0x4b   :  { %v351_v14 = vrot.slane %v350_v7, 1  ;;  %v385_v15 = vrot.slane %v384_v8, 2  ;;  %v418_v16 = vadd.f32 %v417_v12, %v416_v9  ;;  %v841_v17 = vadd.f32 %v755_v61, %v185_v6 }
  0x4c   :  { %vm449_vm13 = vcmp.eq.f32.partialorder %v742_v57, 7.0  ;;  %v450_v56 = vsel %vm448_vm12, 1.0, %v679_v0  ;;  %v461_v59 = vsel %vm448_vm12, %v832_v10, 0.0  ;;  %v331_v21 = vsel %vm328_vm15, %v316_v11, %v295_v13  ;;  %v556_v13 = vld [vmem:[%s1014_s3] sm:$0xff] }
  0x4d   :  { %v352_v2 = vadd.f32 %v351_v14, %v350_v7  ;;  %v386_v18 = vadd.f32 %v385_v15, %v384_v8  ;;  %v419_v19 = vrot.slane %v418_v16, 4  ;;  %v451_v20 = vsel %vm449_vm13, 1.0, %v679_v0 }
  0x4e   :  { %vm364_vm2 = vcmp.eq.s32.totalorder %v736_v54, 4  ;;  %v452_v58 = vsel %vm95_vm0, %v450_v56, 0.0  ;;  %v453_v61 = vsel %vm95_vm0, %v451_v20, 0.0  ;;  %vm400_vm14 = vcmp.eq.s32.totalorder %v736_v54, 5 }
  0x4f   :  { %v387_v6 = vrot.slane %v386_v18, 1  ;;  %v420_v22 = vadd.f32 %v419_v19, %v418_v16  ;;  %v454_v23 = vadd.f32 %v453_v61, %v452_v58  ;;  %vm436_vm12 = vcmp.eq.s32.totalorder %v736_v54, 6 }
  0x50   :  { %v859_v24 = vsel %vm449_vm13, %v841_v17, 0.0  ;;  %v862_v25 = vsel %vm95_vm0, %v461_v59, 0.0  ;;  %v209_v26 = vsel %vm195_vm4, %v832_v10, 0.0  ;;  %v367_v27 = vsel %vm364_vm2, %v352_v2, %v331_v21 }
  0x51   :  { %v421_v28 = vrot.slane %v420_v22, 2  ;;  %v455_v29 = vrot.slane %v454_v23, 4  ;;  %v210_v30 = vsel %vm196_vm6, %v841_v17, 0.0  ;;  %v388_v31 = vadd.f32 %v387_v6, %v386_v18 }
  0x52   :  { %v211_v32 = vsel %vm95_vm0, %v209_v26, 0.0  ;;  %v212_v33 = vsel %vm95_vm0, %v210_v30, 0.0  ;;  %v245_v34 = vsel %vm232_vm5, %v832_v10, 0.0  ;;  %vm472_vm4 = vcmp.eq.s32.totalorder %v736_v54, 7 }
  0x53   :  { %v422_v35 = vadd.f32 %v421_v28, %v420_v22  ;;  %v456_v36 = vadd.f32 %v455_v29, %v454_v23  ;;  %v213_v37 = vadd.f32 %v212_v33, %v211_v32  ;;  %v877_v38 = vadd.s32 8, %v736_v54 }
  0x54   :  { %v246_v39 = vsel %vm233_vm7, %v841_v17, 0.0  ;;  %v247_v40 = vsel %vm95_vm0, %v245_v34, 0.0  ;;  %v281_v41 = vsel %vm268_vm8, %v832_v10, 0.0  ;;  %v403_v46 = vsel %vm400_vm14, %v388_v31, %v367_v27 }
  0x55   :  { %v423_v42 = vrot.slane %v422_v35, 1  ;;  %v457_v43 = vrot.slane %v456_v36, 2  ;;  %v214_v44 = vrot.slane %v213_v37, 4  ;;  %v248_v45 = vsel %vm95_vm0, %v246_v39, 0.0 }
  0x56   :  { %v249_v47 = vadd.f32 %v248_v45, %v247_v40  ;;  %v282_v48 = vsel %vm269_vm9, %v841_v17, 0.0  ;;  %v283_v49 = vsel %vm95_vm0, %v281_v41, 0.0  ;;  %v317_v63 = vsel %vm304_vm10, %v832_v10, 0.0 }
  0x57   :  { %v424_v50 = vadd.f32 %v423_v42, %v422_v35  ;;  %v458_v51 = vadd.f32 %v457_v43, %v456_v36  ;;  %v215_v52 = vadd.f32 %v214_v44, %v213_v37  ;;  %v284_v53 = vsel %vm95_vm0, %v282_v48, 0.0 }
  0x58   :  { %v250_v60 = vrot.slane %v249_v47, 4  ;;  %v285_v62 = vadd.f32 %v284_v53, %v283_v49  ;;  %v318_v1 = vsel %vm305_vm11, %v841_v17, 0.0  ;;  %vm227_vm5 = vcmp.eq.s32.totalorder %v877_v38, 10 }
  0x59   :  { %v459_v3 = vrot.slane %v458_v51, 1  ;;  %v216_v4 = vrot.slane %v215_v52, 2  ;;  %v319_v5 = vsel %vm95_vm0, %v317_v63, 0.0  ;;  %v439_v7 = vsel %vm436_vm12, %v424_v50, %v403_v46 }
  0x5a   :  { %v251_v8 = vadd.f32 %v250_v60, %v249_v47  ;;  %v286_v9 = vrot.slane %v285_v62, 4  ;;  %v320_v11 = vsel %vm95_vm0, %v318_v1, 0.0  ;;  %vm1020_vm6 = vcmp.eq.f32.partialorder %v738_v55, 4.0 }
  0x5b   :  { %v460_v12 = vadd.f32 %v459_v3, %v458_v51  ;;  %v217_v14 = vadd.f32 %v216_v4, %v215_v52  ;;  %v321_v15 = vadd.f32 %v320_v11, %v319_v5  ;;  %v353_v16 = vsel %vm1020_vm6, %v832_v10, 0.0 }
  0x5c   :  { %v252_v56 = vrot.slane %v251_v8, 2  ;;  %v287_v59 = vadd.f32 %v286_v9, %v285_v62  ;;  %vm1021_vm7 = vcmp.eq.f32.partialorder %v742_v57, 4.0  ;;  %v355_v18 = vsel %vm95_vm0, %v353_v16, 0.0 }
  0x5d   :  { %v354_v2 = vsel %vm1021_vm7, %v841_v17, 0.0  ;;  %v475_v19 = vsel %vm472_vm4, %v460_v12, %v439_v7  ;;  %v218_v20 = vrot.slane %v217_v14, 1  ;;  %v322_v21 = vrot.slane %v321_v15, 4 }
  0x5e   :  { %v356_v58 = vsel %vm95_vm0, %v354_v2, 0.0  ;;  %v559_v61 = vadd.f32 %v556_v13, %v475_v19  ;;  %v253_v6 = vadd.f32 %v252_v56, %v251_v8  ;;  %v288_v22 = vrot.slane %v287_v59, 2 }
  0x5f   :  { %v357_v23 = vadd.f32 %v356_v58, %v355_v18  ;;  %v219_v26 = vadd.f32 %v218_v20, %v217_v14  ;;  %vm263_vm8 = vcmp.eq.s32.totalorder %v877_v38, 11  ;;  %v323_v27 = vadd.f32 %v322_v21, %v321_v15 }
  0x60   :  { %vm1022_vm9 = vcmp.eq.f32.partialorder %v738_v55, 5.0  ;;  %562 = vst.msk [vmem:[%s1014_s3] sm:$0xff] %vm95_vm0, %v559_v61  ;;  %v254_v29 = vrot.slane %v253_v6, 1  ;;  %v289_v30 = vadd.f32 %v288_v22, %v287_v59  ;;  %v390_v32 = vsel %vm377_vm1, %v841_v17, 0.0 }
  0x61   :  { %v389_v28 = vsel %vm1022_vm9, %v832_v10, 0.0  ;;  %v358_v31 = vrot.slane %v357_v23, 4  ;;  %v230_v33 = vsel %vm227_vm5, %v219_v26, 0.0  ;;  %v324_v34 = vrot.slane %v323_v27, 2 }
  0x62   :  { %v391_v35 = vsel %vm95_vm0, %v389_v28, 0.0  ;;  %v392_v36 = vsel %vm95_vm0, %v390_v32, 0.0  ;;  %v255_v37 = vadd.f32 %v254_v29, %v253_v6  ;;  %v290_v39 = vrot.slane %v289_v30, 1 }
  0x63   :  { %v359_v40 = vadd.f32 %v358_v31, %v357_v23  ;;  %v393_v41 = vadd.f32 %v392_v36, %v391_v35  ;;  %vm299_vm10 = vcmp.eq.s32.totalorder %v877_v38, 12  ;;  %v325_v42 = vadd.f32 %v324_v34, %v323_v27 }
  0x64   :  { %vm484_vm11 = vcmp.eq.f32.partialorder %v738_v55, 8.0  ;;  %vm485_vm14 = vcmp.eq.f32.partialorder %v742_v57, 8.0  ;;  %v266_v43 = vsel %vm263_vm8, %v255_v37, %v230_v33  ;;  %v291_v44 = vadd.f32 %v290_v39, %v289_v30 }
  0x65   :  { %v360_v45 = vrot.slane %v359_v40, 2  ;;  %v394_v46 = vrot.slane %v393_v41, 4  ;;  %v326_v47 = vrot.slane %v325_v42, 1  ;;  %vm335_vm1 = vcmp.eq.s32.totalorder %v877_v38, 13 }
  0x66   :  { %v486_v48 = vsel %vm484_vm11, 1.0, %v679_v0  ;;  %v487_v49 = vsel %vm485_vm14, 1.0, %v679_v0  ;;  %v302_v50 = vsel %vm299_vm10, %v291_v44, %v266_v43  ;;  %vm520_vm15 = vcmp.eq.f32.partialorder %v738_v55, 9.0 }
  0x67   :  { %v361_v51 = vadd.f32 %v360_v45, %v359_v40  ;;  %v395_v52 = vadd.f32 %v394_v46, %v393_v41  ;;  %v488_v53 = vsel %vm95_vm0, %v486_v48, 0.0  ;;  %v327_v60 = vadd.f32 %v326_v47, %v325_v42 }
  0x68   :  { %v489_v62 = vsel %vm95_vm0, %v487_v49, 0.0  ;;  %vm521_vm13 = vcmp.eq.f32.partialorder %v742_v57, 9.0  ;;  %v522_v4 = vsel %vm520_vm15, 1.0, %v679_v0  ;;  %v464_v5 = vsel %vm95_vm0, %v859_v24, 0.0 }
  0x69   :  { %v362_v63 = vrot.slane %v361_v51, 1  ;;  %v396_v1 = vrot.slane %v395_v52, 2  ;;  %v490_v3 = vadd.f32 %v489_v62, %v488_v53  ;;  %vm371_vm2 = vcmp.eq.s32.totalorder %v877_v38, 14 }
  0x6a   :  { %v523_v7 = vsel %vm521_vm13, 1.0, %v679_v0  ;;  %v524_v8 = vsel %vm95_vm0, %v522_v4, 0.0  ;;  %v338_v14 = vsel %vm335_vm1, %v327_v60, %v302_v50  ;;  %v425_v24 = vsel %vm412_vm3, %v832_v10, 0.0  ;;  %v557_v50 = vld [vmem:[%s1014_s3 + $0x8] sm:$0xff] }
  0x6b   :  { %v363_v9 = vadd.f32 %v362_v63, %v361_v51  ;;  %v397_v11 = vadd.f32 %v396_v1, %v395_v52  ;;  %v491_v12 = vrot.slane %v490_v3, 4  ;;  %v525_v13 = vsel %vm95_vm0, %v523_v7, 0.0 }
  0x6c   :  { %v526_v15 = vadd.f32 %v525_v13, %v524_v8  ;;  %vm1023_vm12 = vcmp.eq.f32.partialorder %v742_v57, 6.0  ;;  %v427_v59 = vsel %vm95_vm0, %v425_v24, 0.0  ;;  %vm407_vm4 = vcmp.eq.s32.totalorder %v877_v38, 15 }
  0x6d   :  { %v426_v16 = vsel %vm1023_vm12, %v841_v17, 0.0  ;;  %v398_v0 = vrot.slane %v397_v11, 1  ;;  %v492_v56 = vadd.f32 %v491_v12, %v490_v3  ;;  %v465_v19 = vadd.f32 %v464_v5, %v862_v25 }
  0x6e   :  { %v527_v2 = vrot.slane %v526_v15, 4  ;;  %v428_v18 = vsel %vm95_vm0, %v426_v16, 0.0  ;;  %v374_v20 = vsel %vm371_vm2, %v363_v9, %v338_v14  ;;  %v497_v23 = vsel %vm484_vm11, %v832_v10, 0.0 }
  0x6f   :  { %v399_v21 = vadd.f32 %v398_v0, %v397_v11  ;;  %v493_v58 = vrot.slane %v492_v56, 2  ;;  %v429_v61 = vadd.f32 %v428_v18, %v427_v59  ;;  %v466_v22 = vrot.slane %v465_v19, 4 }
  0x70   :  { %v528_v6 = vadd.f32 %v527_v2, %v526_v15  ;;  %v498_v26 = vsel %vm485_vm14, %v841_v17, 0.0  ;;  %vm509_vm3 = vcmp.eq.s32.totalorder %v877_v38, 8  ;;  %v499_v28 = vsel %vm95_vm0, %v497_v23, 0.0  ;;  %v558_v15 = vld [vmem:[%s1014_s3 + $0x10] sm:$0xf] }
  0x71   :  { %v494_v27 = vadd.f32 %v493_v58, %v492_v56  ;;  %v430_v25 = vrot.slane %v429_v61, 4  ;;  %v410_v29 = vsel %vm407_vm4, %v399_v21, %v374_v20  ;;  %v467_v31 = vadd.f32 %v466_v22, %v465_v19 }
  0x72   :  { %v529_v30 = vrot.slane %v528_v6, 2  ;;  %v500_v32 = vsel %vm95_vm0, %v498_v26, 0.0  ;;  %v533_v36 = vsel %vm520_vm15, %v832_v10, 0.0  ;;  %v534_v40 = vsel %vm521_vm13, %v841_v17, 0.0 }
  0x73   :  { %v495_v33 = vrot.slane %v494_v27, 1  ;;  %v431_v34 = vadd.f32 %v430_v25, %v429_v61  ;;  %v501_v35 = vadd.f32 %v500_v32, %v499_v28  ;;  %v468_v39 = vrot.slane %v467_v31, 2 }
  0x74   :  { %v530_v37 = vadd.f32 %v529_v30, %v528_v6  ;;  %v535_v41 = vsel %vm95_vm0, %v533_v36, 0.0  ;;  %v536_v45 = vsel %vm95_vm0, %v534_v40, 0.0  ;;  %v194_v47 = vadd.s32 16, %v736_v54 }
  0x75   :  { %v496_v42 = vadd.f32 %v495_v33, %v494_v27  ;;  %v432_v43 = vrot.slane %v431_v34, 2  ;;  %v502_v44 = vrot.slane %v501_v35, 4  ;;  %v469_v48 = vadd.f32 %v468_v39, %v467_v31 }
  0x76   :  { %v531_v46 = vrot.slane %v530_v37, 1  ;;  %v537_v49 = vadd.f32 %v536_v45, %v535_v41  ;;  %vm545_vm5 = vcmp.eq.s32.totalorder %v877_v38, 9  ;;  %vm444_vm6 = vcmp.eq.s32.totalorder %v194_v47, 16 }
  0x77   :  { %v512_v55 = vsel %vm509_vm3, %v496_v42, %v410_v29  ;;  %v433_v10 = vadd.f32 %v432_v43, %v431_v34  ;;  %v503_v57 = vadd.f32 %v502_v44, %v501_v35  ;;  %v470_v51 = vrot.slane %v469_v48, 1 }
  0x78   :  { %v532_v17 = vadd.f32 %v531_v46, %v530_v37  ;;  %v538_v52 = vrot.slane %v537_v49, 4  ;;  %vm480_vm7 = vcmp.eq.s32.totalorder %v194_v47, 17  ;;  %vm516_vm8 = vcmp.eq.s32.totalorder %v194_v47, 18 }
  0x79   :  { %v434_v53 = vrot.slane %v433_v10, 1  ;;  %v504_v60 = vrot.slane %v503_v57, 2  ;;  %v471_v54 = vadd.f32 %v470_v51, %v469_v48  ;;  %vm552_vm9 = vcmp.eq.s32.totalorder %v194_v47, 19 }
  0x7a   :  { %v548_v62 = vsel %vm545_vm5, %v532_v17, %v512_v55  ;;  %v539_v63 = vadd.f32 %v538_v52, %v537_v49  ;;  %vm1024_vm10 = vcmask 257024  }
  0x7b   :  { %v560_v1 = vadd.f32 %v557_v50, %v548_v62  ;;  %v435_v3 = vadd.f32 %v434_v53, %v433_v10  ;;  %v505_v4 = vadd.f32 %v504_v60, %v503_v57 }
  0x7c   :  { %v540_v38 = vrot.slane %v539_v63, 2 }
  0x7d   :  { %563 = vst.msk [vmem:[%s1014_s3 + $0x8] sm:$0xff] %vm95_vm0, %v560_v1  ;;  %v447_v5 = vsel %vm444_vm6, %v435_v3, 0.0  ;;  %v506_v7 = vrot.slane %v505_v4, 1 }
  0x7e   :  { %v483_v8 = vsel %vm480_vm7, %v471_v54, %v447_v5  ;;  %v541_v9 = vadd.f32 %v540_v38, %v539_v63 }
  0x7f   :  { %v507_v11 = vadd.f32 %v506_v7, %v505_v4 }
  0x80   :  { %v542_v12 = vrot.slane %v541_v9, 1 }
  0x81   :  { %v519_v13 = vsel %vm516_vm8, %v507_v11, %v483_v8 }
  0x82   :  { %v543_v14 = vadd.f32 %v542_v12, %v541_v9 }
  0x84   :  { %v555_v24 = vsel %vm552_vm9, %v543_v14, %v519_v13 }
  0x85   :  { %v561_v16 = vadd.f32 %v558_v15, %v555_v24 }
  0x87   :  { %565 = vst.msk [vmem:[%s1014_s3 + $0x10] sm:$0xf] %vm1024_vm10, %v561_v16 }
  0x88   :  { %570 = vsyncpa [#allocation3], 1 }
  0x89   :  { %571 = vsyncpa [#allocation5], 1 }

</bundles_post_ra>
